<compile_context>
chip_gen: v6e
topology: v6e:2x2x1
jax: 0.10.0
libtpu: 0.0.40
codegen_flags: <defaults>
</compile_context>

<pallas_src>
import functools

import jax
import jax.numpy as jnp
from jax.experimental import pallas as pl
from jax.experimental.pallas import tpu as pltpu


_LANE = 128
_MAX_ROW_TILE = 4096


def _cdiv(a, b):
    return -(-a // b)


def _round_up(a, m):
    return _cdiv(a, m) * m


def _vmem_capacity_bytes() -> int:
    """Physical VMEM per TensorCore; conservative 64 MiB fallback."""
    try:
        cap = int(pltpu.get_tpu_info().vmem_capacity_bytes)
        if cap > 0:
            return cap
    except Exception:
        pass
    return 64 << 20


def _rmsnorm_kernel(x_ref, w_ref, o_ref, *, eps, inv_e, tile_rows, total_rows,
                    ragged_rows):
    # x_ref: (tile_rows, E_pad) tile; w_ref: (1, E_pad) already in out dtype.
    x = x_ref[...].astype(jnp.float32)
    if ragged_rows:
        # The final block overhangs the row count.  Pallas discards the
        # out-of-bounds part of the store; we also zero those garbage rows so
        # they can never produce non-finite intermediates.  On non-final
        # blocks the mask is all-true (pass-through); cheap VPU select.
        i = pl.program_id(0)
        valid = total_rows - i * tile_rows
        row_ids = jax.lax.broadcasted_iota(jnp.int32, (tile_rows, 1), 0)
        x = jnp.where(row_ids < valid, x, 0.0)
    # Padded lanes (and masked rows) are zero => the sum is exact; divide by
    # the *real* E to recover the mean of squares.
    ms = jnp.sum(x * x, axis=-1, keepdims=True) * inv_e
    inv = jax.lax.rsqrt(ms + eps)
    normed = (x * inv).astype(x_ref.dtype)            # matches .type_as(x)
    o_ref[...] = (w_ref[...] * normed).astype(o_ref.dtype)


def _choose_row_tile(rows, bytes_per_row, row_align, budget, min_steps,
                     prefer_even_steps):
    """Largest VMEM-fitting row tile; prefer divisor tiles, then even grids."""
    t_max = (budget // bytes_per_row) // row_align * row_align
    t_max = max(row_align, min(_MAX_ROW_TILE, t_max))
    rows_aligned = _round_up(rows, row_align)
    t_max = min(t_max, rows_aligned)
    # Enough grid steps for DMA/compute/writeback overlap (and >= 2 steps per
    # TensorCore on v7x-like parts).
    if rows_aligned >= min_steps * row_align:
        t_max = min(t_max, _round_up(_cdiv(rows, min_steps), row_align))
    t_max = max(row_align, t_max)

    lo = max(row_align, (t_max // 2) // row_align * row_align)
    best_t, best_key = t_max, None
    t = t_max
    while t >= lo:
        steps = _cdiv(rows, t)
        overhang = steps * t - rows
        even_ok = (steps % 2 == 0) or (steps == 1) or (not prefer_even_steps)
        # prefer: divisor tile > even step count (megacore) > least overhang >
        # biggest tile
        key = (overhang == 0, even_ok, -overhang, t)
        if best_key is None or key > best_key:
            best_t, best_key = t, key
        t -= row_align
    steps = _cdiv(rows, best_t)
    if steps == 1:
        # A single block equal to the full dim is always legal and removes the
        # ragged overhang entirely.
        best_t = rows
    return best_t, steps


def rmsnorm(x: jax.Array, weight: jax.Array, eps: float = 1e-6) -> jax.Array:
    """x: (B, S, E), weight: (E,). Returns (B, S, E)."""
    B, S, E = x.shape
    rows = B * S
    out_dtype = jnp.result_type(x.dtype, weight.dtype)
    in_bytes = jnp.dtype(x.dtype).itemsize
    out_bytes = jnp.dtype(out_dtype).itemsize
    # Native sublane packing: 8 rows for 32-bit, 16 for 16-bit, 32 for 8-bit.
    row_align = max(8, 32 // min(in_bytes, out_bytes))

    vmem_cap = _vmem_capacity_bytes()
    small_vmem = vmem_cap <= (96 << 20)        # v7x-like: 64 MiB / TC, 2 TCs
    budget = int(vmem_cap * 45) // 100         # ~45% of physical VMEM
    min_steps = 4 if small_vmem else 3

    # Lane-dense output stores: pad E to a multiple of 128 only when needed.
    e_pad = E if E % _LANE == 0 else _round_up(E, _LANE)

    # Per-row VMEM bytes: double-buffered x and out tiles plus the in-kernel
    # f32 temporaries (f32 cast of the tile + f32 x*inv product; one temp when
    # the input is already f32).
    f32_temp_bytes = (2 if in_bytes < 4 else 1) * 4
    bytes_per_row = e_pad * (2 * in_bytes + 2 * out_bytes + f32_temp_bytes)

    tile, steps = _choose_row_tile(rows, bytes_per_row, row_align, budget,
                                   min_steps, prefer_even_steps=small_vmem)
    ragged_rows = (steps * tile != rows)

    x2d = x.reshape(rows, E)
    w2d = weight.astype(out_dtype).reshape(1, E)     # cast once, not per step
    if e_pad != E:
        x2d = jnp.pad(x2d, ((0, 0), (0, e_pad - E)))
        w2d = jnp.pad(w2d, ((0, 0), (0, e_pad - E)))

    # Working set: x/out double buffers + f32 temps + weight row (padded to 8
    # sublanes, double-buffered); 30% headroom, never above 80% of physical.
    working = tile * bytes_per_row + 8 * e_pad * out_bytes * 2
    vmem_limit = int(min(vmem_cap * 4 // 5,
                         max(32 << 20, working * 13 // 10)))

    kernel = functools.partial(
        _rmsnorm_kernel, eps=float(eps), inv_e=1.0 / E, tile_rows=tile,
        total_rows=rows, ragged_rows=ragged_rows)

    out2d = pl.pallas_call(
        kernel,
        out_shape=jax.ShapeDtypeStruct((rows, e_pad), out_dtype),
        grid_spec=pltpu.PrefetchScalarGridSpec(
            num_scalar_prefetch=0,
            grid=(steps,),
            in_specs=[
                pl.BlockSpec((tile, e_pad), lambda i: (i, 0)),   # x tile
                pl.BlockSpec((1, e_pad), lambda i: (0, 0)),      # weight row
            ],
            out_specs=pl.BlockSpec((tile, e_pad), lambda i: (i, 0)),
        ),
        compiler_params=pltpu.CompilerParams(
            dimension_semantics=("parallel",),
            vmem_limit_bytes=vmem_limit,
        ),
    )(x2d, w2d)

    if e_pad != E:
        out2d = out2d[:, :E]
    return out2d.reshape(B, S, E)


def rmsnorm_ref(x, weight, eps=1e-6):
    xf = x.astype(jnp.float32)
    inv = jax.lax.rsqrt(jnp.mean(xf * xf, axis=-1, keepdims=True) + eps)
    return weight * (xf * inv).astype(x.dtype)


if __name__ == "__main__":
    key = jax.random.PRNGKey(0)
    k1, k2, k3 = jax.random.split(key, 3)

    # Case 1: the module's (B, S, E) contract at small shapes, f32, weights=1.
    B, S, E = 2, 8, 32
    x = jax.random.normal(k1, (B, S, E), dtype=jnp.float32)
    weight = jnp.ones((E,), dtype=jnp.float32)   # nn.Parameter(torch.ones(dim))
    out = rmsnorm(x, weight)
    jax.block_until_ready(out)
    ref = rmsnorm_ref(x, weight)
    assert out.shape == (B, S, E) and out.dtype == ref.dtype
    assert jnp.allclose(out, ref, atol=1e-5, rtol=1e-5)

    # Case 2: bf16 input with awkward row/E sizes (single full-array block,
    # lane padding path).
    B2, S2, E2 = 2, 5, 48
    x2 = jax.random.normal(k2, (B2, S2, E2), dtype=jnp.bfloat16)
    w2 = jnp.ones((E2,), dtype=jnp.float32)
    out2 = rmsnorm(x2, w2)
    jax.block_until_ready(out2)
    ref2 = rmsnorm_ref(x2, w2)
    assert out2.shape == (B2, S2, E2)
    assert jnp.allclose(out2.astype(jnp.float32), ref2.astype(jnp.float32),
                        atol=2e-2, rtol=2e-2)

    # Case 3: row count not divisible by the chosen tile (exercises the
    # in-kernel masked final block that replaced the wrapper row-padding).
    B3, S3, E3 = 3, 23, 64
    x3 = jax.random.normal(k3, (B3, S3, E3), dtype=jnp.float32)
    w3 = jax.random.normal(jax.random.PRNGKey(42), (E3,), dtype=jnp.float32)
    out3 = rmsnorm(x3, w3)
    jax.block_until_ready(out3)
    ref3 = rmsnorm_ref(x3, w3)
    assert out3.shape == (B3, S3, E3)
    assert jnp.allclose(out3, ref3, atol=1e-5, rtol=1e-5)

    print("KERNEL_OK")
</pallas_src>

<mosaic_0001>
module attributes {stable_mosaic.version = 11 : i64} {
  func.func @_rmsnorm_kernel(%arg0: i32, %arg1: memref<16x128xf32, #tpu.memory_space<vmem>>, %arg2: memref<1x128xf32, #tpu.memory_space<vmem>>, %arg3: memref<16x128xf32, #tpu.memory_space<vmem>>) attributes {dimension_semantics = [#tpu.dimension_semantics<parallel>], iteration_bounds = array<i64: 1>, scalar_prefetch = 0 : i64, scratch_operands = 0 : i64, tpu.core_type = #tpu.core_type<tc>, window_params = [{transform_indices = @transform_0, window_bounds = array<i64: 16, 128>}, {pipeline_mode = #tpu.pipeline_mode<synchronous>, transform_indices = @transform_1, window_bounds = array<i64: 1, 128>}, {transform_indices = @transform_2, window_bounds = array<i64: 16, 128>}]} {
    %c0 = arith.constant 0 : index
    %c0_0 = arith.constant 0 : index
    %0 = vector.load %arg1[%c0, %c0_0] : memref<16x128xf32, #tpu.memory_space<vmem>>, vector<16x128xf32>
    %1 = arith.mulf %0, %0 : vector<16x128xf32>
    %cst = arith.constant dense<0.000000e+00> : vector<16xf32>
    %2 = vector.multi_reduction <add>, %1, %cst [1] : vector<16x128xf32> to vector<16xf32>
    %3 = vector.shape_cast %2 : vector<16xf32> to vector<16x1xf32>
    %cst_1 = arith.constant 3.125000e-02 : f32
    %4 = vector.broadcast %cst_1 : f32 to vector<16x1xf32>
    %5 = arith.mulf %3, %4 : vector<16x1xf32>
    %cst_2 = arith.constant 9.99999997E-7 : f32
    %6 = vector.broadcast %cst_2 : f32 to vector<16x1xf32>
    %7 = arith.addf %5, %6 : vector<16x1xf32>
    %8 = math.rsqrt %7 : vector<16x1xf32>
    %9 = vector.broadcast %8 : vector<16x1xf32> to vector<16x128xf32>
    %10 = arith.mulf %0, %9 : vector<16x128xf32>
    %c0_3 = arith.constant 0 : index
    %c0_4 = arith.constant 0 : index
    %11 = vector.load %arg2[%c0_3, %c0_4] : memref<1x128xf32, #tpu.memory_space<vmem>>, vector<1x128xf32>
    %12 = vector.broadcast %11 : vector<1x128xf32> to vector<16x128xf32>
    %13 = arith.mulf %12, %10 : vector<16x128xf32>
    %c0_5 = arith.constant 0 : index
    %c0_6 = arith.constant 0 : index
    %14 = vector.load %arg3[%c0_5, %c0_6] : memref<16x128xf32, #tpu.memory_space<vmem>>, vector<16x128xf32>
    tpu.vector_store %arg3[%c0_5, %c0_6], %13 {strides = array<i32>} : memref<16x128xf32, #tpu.memory_space<vmem>>, vector<16x128xf32>,
    return
  }
  func.func @transform_0(%arg0: i32) -> (i32, i32) {
    %c0_i32 = arith.constant 0 : i32
    %c0_i32_0 = arith.constant 0 : i32
    return %arg0, %c0_i32 : i32, i32
  }
  func.func @transform_1(%arg0: i32) -> (i32, i32) {
    %c0_i32 = arith.constant 0 : i32
    %c0_i32_0 = arith.constant 0 : i32
    %c0_i32_1 = arith.constant 0 : i32
    return %c0_i32, %c0_i32_0 : i32, i32
  }
  func.func @transform_2(%arg0: i32) -> (i32, i32) {
    %c0_i32 = arith.constant 0 : i32
    %c0_i32_0 = arith.constant 0 : i32
    return %arg0, %c0_i32 : i32, i32
  }
}

</mosaic_0001>

<bundles_post_ra>
// kernel: tpu_custom_call.1
= control target key start
LH: loop header
LB: loop body
LE: loop exit
PB: predicated region body
PF: predicated region fallthrough
CT: control target
= control target key end

     0   :  { %7 = vsyncpa [#allocation3], 0  ;;  %s157_s0 = inlined_call_operand.hbm [shape: f32[16,128], index: 0, kind: input, shape index: {}]   ;;  %s158_s1 = inlined_call_operand.vmem [shape: f32[1,128], index: 1, kind: input, shape index: {}]   ;;  %s159_s2 = inlined_call_operand.hbm [shape: f32[16,128], index: 2, kind: output, shape index: {}]  }
   0x1   :  { %8 = vsyncpa [#allocation4], 0  ;;  %s123_s9 = smov [#allocation2]  }
   0x2   :  { %s14_s10 = sshll.u32 %s123_s9, 4  ;;  %s15_s10 = int_to_ptr.vmem [resolvable:$true] %s14_s10 }
   0x3   :  { %s87_s11 = scalar_lea.vmem %s15_s10, 256  ;;  %p92_p1 = scmp.lt.s32.totalorder %s15_s10, %s15_s10 }
   0x4   :  { %p88_p0 = scmp.ne.s32.totalorder %s15_s10, %s87_s11  ;;  %p93_p2 = scmp.lt.s32.totalorder %s87_s11, %s87_s11 }
   0x6   :  { %p94_p3 = por %p93_p2, %p92_p1 }
   0x8   :  { %p95_p4 = pnand %p94_p3, %p88_p0 }
   0xa   :  { %98 = shalt.err (!%p95_p4)
}
   0xb   :  { %s124_s12 = smov 128   ;;  %s125_s13 = smov 8  }
   0xc   :  { %20 = dma.hbm_to_vmem [thread:$0]  %s157_s0, 256, %s15_s10, [#allocation3], %s124_s12, %s124_s12, %s125_s13  }
   0xd   :  { %119 = dma.done.wait [#allocation3], 256  }
   0xe   :  { %120 = vsyncadd [#allocation3], 4294967040  ;;  %v26_v0 = vld [vmem:[#allocation2] sm:$0xff]  ;;  %v27_v1 = vld [vmem:[#allocation2 + $0x8] sm:$0xff]  ;;  %s126_s0 = smov [#allocation5]  }
   0xf   :  { %v28_v2 = vmul.f32 %v26_v0, %v26_v0  ;;  %v29_v3 = vmul.f32 %v27_v1, %v27_v1  ;;  %v70_v11 = vld [vmem:[%s158_s1] ss:$0 sm:$0xff]  ;;  %s58_s18 = sshll.u32 %s126_s0, 4  ;;  %s59_s18 = int_to_ptr.vmem [resolvable:$true] %s58_s18 }
  0x10   :  { %s99_s19 = scalar_lea.vmem %s59_s18, 256  ;;  %p104_p6 = scmp.lt.s32.totalorder %s59_s18, %s59_s18 }
  0x11   :  { %30 = vadd.xlane.f32.xlu0 %v28_v2  ;;  %p100_p5 = scmp.ne.s32.totalorder %s59_s18, %s99_s19  ;;  %p105_p7 = scmp.lt.s32.totalorder %s99_s19, %s99_s19 }
  0x13   :  { %p106_p8 = por %p105_p7, %p104_p6 }
  0x15   :  { %32 = vadd.xlane.f32.xlu0 %v29_v3  ;;  %p107_p9 = pnand %p106_p8, %p100_p5 }
  0x9a   :  { %v31_v4 = vpop.xlane.xlu0 %30 }
  0x9b   :  { %v34_v5 = vmul.f32 0.03125, %v31_v4 }
  0x9d   :  { %v36_v6 = vadd.f32 1e-06, %v34_v5 }
  0x9e   :  { %v33_v7 = vpop.xlane.xlu0 %32 }
  0x9f   :  { %75 = vrsqrt.f32 %v36_v6  ;;  %v35_v8 = vmul.f32 0.03125, %v33_v7 }
  0xa1   :  { %v37_v9 = vadd.f32 1e-06, %v35_v8 }
  0xa3   :  { %77 = vrsqrt.f32 %v37_v9 }
  0xac   :  { %v76_v10 = vpop.eup %75 }
  0xad   :  { %v40_v12 = vmul.f32 %v76_v10, %v26_v0 }
  0xaf   :  { %v49_v13 = vmul.f32 %v70_v11, %v40_v12 }
  0xb0   :  { %v78_v14 = vpop.eup %77 }
  0xb1   :  { %v41_v15 = vmul.f32 %v78_v14, %v27_v1  ;;  %51 = vst [vmem:[#allocation5] sm:$0xff] %v49_v13 }
  0xb3   :  { %v50_v16 = vmul.f32 %v70_v11, %v41_v15 }
  0xb5   :  { %52 = vst [vmem:[#allocation5 + $0x8] sm:$0xff] %v50_v16 }
  0xb6   :  { %110 = shalt.err (!%p107_p9)
}
  0xb7   :  { %64 = dma.vmem_to_hbm [thread:$0]  %s59_s18, 256, %s159_s2, [#allocation4], %s124_s12, %s124_s12, %s125_s13  }
  0xb8   :  { %121 = dma.done.wait [#allocation4], 256  }
  0xb9   :  { %122 = vsyncadd [#allocation4], 4294967040 }
  0xba   :  { %68 = vsyncpa [#allocation3], 1 }
  0xbb   :  { %69 = vsyncpa [#allocation4], 1 }

</bundles_post_ra>
